<compile_context>
chip_gen: v5e
topology: v5e:2x2
jax: 0.10.0
libtpu: 0.0.40
codegen_flags: <defaults>
</compile_context>

<pallas_src>
import jax
import jax.numpy as jnp
from jax.experimental import pallas as pl
from jax.experimental.pallas import tpu as pltpu


def _policy_kernel(x_ref, w1_ref, b1_ref, w2_ref, b2_ref, w3_ref, b3_ref, o_ref):
    # Layer 1: Linear + ReLU (f32 accumulate, f32 epilogue).
    h = jnp.dot(x_ref[...], w1_ref[...], preferred_element_type=jnp.float32)
    h = jnp.maximum(h + b1_ref[...], 0.0)
    # Layer 2: Linear + ReLU.  Cast activations to the weight (compute) dtype
    # for the MXU; bias/ReLU stay f32 (no bf16 VPU dependence -> safe on v5e).
    h = jnp.dot(h.astype(w2_ref.dtype), w2_ref[...], preferred_element_type=jnp.float32)
    h = jnp.maximum(h + b2_ref[...], 0.0)
    # Output layer: W3/b3 already sliced to the "means" half in the wrapper.
    m = jnp.dot(h.astype(w3_ref.dtype), w3_ref[...], preferred_element_type=jnp.float32)
    m = m + b3_ref[...]
    o_ref[...] = jnp.tanh(m).astype(o_ref.dtype)


def state_dependent_policy_forward(states, params, *, block_rows=1024, compute_dtype=None):
    """Fused forward: tanh(net(states).chunk(2, -1)[0]).

    block_rows: batch-tile size when B is large (rounded to a multiple of 8).
    compute_dtype: optional streaming dtype for states/weights (e.g. bf16 on
      v6e/v7x); accumulation and epilogue math stay f32.
    """
    w1, b1, w2, b2, w3, b3 = params
    B, state_dim = states.shape
    h1 = w1.shape[1]
    h2 = w2.shape[1]
    act_dim = w3.shape[1] // 2

    # (1) Slice the output projection to the "means" half outside the kernel.
    w3m = w3[:, :act_dim]
    b3m = b3[:, :act_dim]

    # (2) Optional reduced-precision streaming of the only real HBM traffic.
    if compute_dtype is not None:
        x = states.astype(compute_dtype)
        w1c, w2c, w3c = (w.astype(compute_dtype) for w in (w1, w2, w3m))
    else:
        x = states
        w1c, w2c, w3c = w1, w2, w3m
    b1f = b1.astype(jnp.float32)
    b2f = b2.astype(jnp.float32)
    b3f = b3m.astype(jnp.float32)

    # (3) Batch tiling: full-array block for small B, (tm, .) tiles otherwise.
    if B <= block_rows:
        tm = B                       # block == full array -> always legal
    else:
        tm = max(8, (block_rows // 8) * 8)
    b_pad = -(-B // tm) * tm
    if b_pad != B:
        x = jnp.pad(x, ((0, b_pad - B), (0, 0)))
    grid = (b_pad // tm,)

    flops = 2 * b_pad * (state_dim * h1 + h1 * h2 + h2 * act_dim)
    bytes_accessed = (
        x.size * x.dtype.itemsize
        + sum(a.size * a.dtype.itemsize for a in (w1c, b1f, w2c, b2f, w3c, b3f))
        + b_pad * act_dim * states.dtype.itemsize
    )

    def full_block(arr):
        # Weights/biases: one full-array block, same block for every grid step
        # -> DMA'd once, VMEM-resident across the whole batch sweep.
        return pl.BlockSpec(arr.shape, lambda i: (0, 0))

    out = pl.pallas_call(
        _policy_kernel,
        out_shape=jax.ShapeDtypeStruct((b_pad, act_dim), states.dtype),
        grid=grid,
        in_specs=[
            pl.BlockSpec((tm, state_dim), lambda i: (i, 0)),   # states stream
            full_block(w1c), full_block(b1f),
            full_block(w2c), full_block(b2f),
            full_block(w3c), full_block(b3f),
        ],
        out_specs=pl.BlockSpec((tm, act_dim), lambda i: (i, 0)),
        compiler_params=pltpu.CompilerParams(dimension_semantics=("parallel",)),
        cost_estimate=pl.CostEstimate(
            flops=flops,
            transcendentals=b_pad * act_dim,
            bytes_accessed=bytes_accessed,
        ),
    )(x, w1c, b1f, w2c, b2f, w3c, b3f)

    return out[:B] if b_pad != B else out


def init_params(key, state_dim, action_dim, hidden_units=(256, 256), dtype=jnp.float32):
    """Deterministic synthetic init matching nn.Linear shapes (stored as (in, out))."""
    dims = [state_dim, *hidden_units, 2 * action_dim]
    params = []
    for i in range(len(dims) - 1):
        key, kw, kb = jax.random.split(key, 3)
        fan_in = dims[i]
        bound = 1.0 / jnp.sqrt(jnp.float32(fan_in))
        w = jax.random.uniform(kw, (dims[i], dims[i + 1]), dtype, -bound, bound)
        b = jax.random.uniform(kb, (1, dims[i + 1]), dtype, -bound, bound)
        params.extend([w, b])
    return tuple(params)


def reference_forward(states, params):
    """Pure-JAX reference for correctness checking."""
    w1, b1, w2, b2, w3, b3 = params
    h = jnp.maximum(states @ w1 + b1, 0.0)
    h = jnp.maximum(h @ w2 + b2, 0.0)
    out = h @ w3 + b3
    act_dim = w3.shape[1] // 2
    return jnp.tanh(out[:, :act_dim])


if __name__ == "__main__":
    key = jax.random.PRNGKey(0)
    k_x, k_p = jax.random.split(key)

    batch = 300                  # not a multiple of the tile -> exercises padding
    state_dim = 16
    action_dim = 4
    hidden_units = (256, 256)    # matches the PyTorch module default

    states = jax.random.normal(k_x, (batch, state_dim), jnp.float32)
    params = init_params(k_p, state_dim, action_dim, hidden_units)
    ref = reference_forward(states, params)

    # f32 path (tight check), tiled with TM=128 -> grid=(3,) with padded tail.
    out_f32 = jax.block_until_ready(
        state_dependent_policy_forward(states, params, block_rows=128))
    assert out_f32.shape == (batch, action_dim)
    assert jnp.allclose(out_f32, ref, atol=1e-5, rtol=1e-5), "f32 mismatch vs reference"

    # bf16 streaming path (v6e/v7x memory-roofline option), looser tolerance.
    out_bf16 = jax.block_until_ready(
        state_dependent_policy_forward(states, params, block_rows=128,
                                       compute_dtype=jnp.bfloat16))
    assert out_bf16.shape == (batch, action_dim)
    assert jnp.allclose(out_bf16, ref, atol=5e-2, rtol=5e-2), "bf16 mismatch vs reference"

    print("KERNEL_OK")
</pallas_src>

<mosaic_0001>
module attributes {stable_mosaic.version = 11 : i64} {
  func.func @_policy_kernel(%arg0: i32, %arg1: memref<128x16xf32, #tpu.memory_space<vmem>>, %arg2: memref<16x256xf32, #tpu.memory_space<vmem>>, %arg3: memref<1x256xf32, #tpu.memory_space<vmem>>, %arg4: memref<256x256xf32, #tpu.memory_space<vmem>>, %arg5: memref<1x256xf32, #tpu.memory_space<vmem>>, %arg6: memref<256x4xf32, #tpu.memory_space<vmem>>, %arg7: memref<1x4xf32, #tpu.memory_space<vmem>>, %arg8: memref<128x4xf32, #tpu.memory_space<vmem>>) attributes {dimension_semantics = [#tpu.dimension_semantics<parallel>], iteration_bounds = array<i64: 3>, scalar_prefetch = 0 : i64, scratch_operands = 0 : i64, tpu.core_type = #tpu.core_type<tc>, window_params = [{transform_indices = @transform_0, window_bounds = array<i64: 128, 16>}, {pipeline_mode = #tpu.pipeline_mode<synchronous>, transform_indices = @transform_1, window_bounds = array<i64: 16, 256>}, {pipeline_mode = #tpu.pipeline_mode<synchronous>, transform_indices = @transform_2, window_bounds = array<i64: 1, 256>}, {pipeline_mode = #tpu.pipeline_mode<synchronous>, transform_indices = @transform_3, window_bounds = array<i64: 256, 256>}, {pipeline_mode = #tpu.pipeline_mode<synchronous>, transform_indices = @transform_4, window_bounds = array<i64: 1, 256>}, {pipeline_mode = #tpu.pipeline_mode<synchronous>, transform_indices = @transform_5, window_bounds = array<i64: 256, 4>}, {pipeline_mode = #tpu.pipeline_mode<synchronous>, transform_indices = @transform_6, window_bounds = array<i64: 1, 4>}, {transform_indices = @transform_7, window_bounds = array<i64: 128, 4>}]} {
    %c0 = arith.constant 0 : index
    %c0_0 = arith.constant 0 : index
    %0 = vector.load %arg1[%c0, %c0_0] : memref<128x16xf32, #tpu.memory_space<vmem>>, vector<128x16xf32>
    %c0_1 = arith.constant 0 : index
    %c0_2 = arith.constant 0 : index
    %1 = vector.load %arg2[%c0_1, %c0_2] : memref<16x256xf32, #tpu.memory_space<vmem>>, vector<16x256xf32>
    %cst = arith.constant dense<0.000000e+00> : vector<128x256xf32>
    %2 = tpu.matmul %0, %1, %cst {dimension_numbers = #tpu.dot_dimension_numbers<[1], [0], [0], [1], [0, 0, 1, 1], [], []>} : vector<128x16xf32>, vector<16x256xf32>, vector<128x256xf32> -> vector<128x256xf32>
    %c0_3 = arith.constant 0 : index
    %c0_4 = arith.constant 0 : index
    %3 = vector.load %arg3[%c0_3, %c0_4] : memref<1x256xf32, #tpu.memory_space<vmem>>, vector<1x256xf32>
    %4 = vector.broadcast %3 : vector<1x256xf32> to vector<128x256xf32>
    %5 = arith.addf %2, %4 : vector<128x256xf32>
    %cst_5 = arith.constant 0.000000e+00 : f32
    %6 = vector.broadcast %cst_5 : f32 to vector<128x256xf32>
    %7 = arith.maximumf %5, %6 : vector<128x256xf32>
    %c0_6 = arith.constant 0 : index
    %c0_7 = arith.constant 0 : index
    %8 = vector.load %arg4[%c0_6, %c0_7] : memref<256x256xf32, #tpu.memory_space<vmem>>, vector<256x256xf32>
    %cst_8 = arith.constant dense<0.000000e+00> : vector<128x256xf32>
    %9 = tpu.matmul %7, %8, %cst_8 {dimension_numbers = #tpu.dot_dimension_numbers<[1], [0], [0], [1], [0, 0, 1, 1], [], []>} : vector<128x256xf32>, vector<256x256xf32>, vector<128x256xf32> -> vector<128x256xf32>
    %c0_9 = arith.constant 0 : index
    %c0_10 = arith.constant 0 : index
    %10 = vector.load %arg5[%c0_9, %c0_10] : memref<1x256xf32, #tpu.memory_space<vmem>>, vector<1x256xf32>
    %11 = vector.broadcast %10 : vector<1x256xf32> to vector<128x256xf32>
    %12 = arith.addf %9, %11 : vector<128x256xf32>
    %cst_11 = arith.constant 0.000000e+00 : f32
    %13 = vector.broadcast %cst_11 : f32 to vector<128x256xf32>
    %14 = arith.maximumf %12, %13 : vector<128x256xf32>
    %c0_12 = arith.constant 0 : index
    %c0_13 = arith.constant 0 : index
    %15 = vector.load %arg6[%c0_12, %c0_13] : memref<256x4xf32, #tpu.memory_space<vmem>>, vector<256x4xf32>
    %cst_14 = arith.constant dense<0.000000e+00> : vector<128x4xf32>
    %16 = tpu.matmul %14, %15, %cst_14 {dimension_numbers = #tpu.dot_dimension_numbers<[1], [0], [0], [1], [0, 0, 1, 1], [], []>} : vector<128x256xf32>, vector<256x4xf32>, vector<128x4xf32> -> vector<128x4xf32>
    %c0_15 = arith.constant 0 : index
    %c0_16 = arith.constant 0 : index
    %17 = vector.load %arg7[%c0_15, %c0_16] : memref<1x4xf32, #tpu.memory_space<vmem>>, vector<1x4xf32>
    %18 = vector.broadcast %17 : vector<1x4xf32> to vector<128x4xf32>
    %19 = arith.addf %16, %18 : vector<128x4xf32>
    %20 = math.tanh %19 : vector<128x4xf32>
    %c0_17 = arith.constant 0 : index
    %c0_18 = arith.constant 0 : index
    %21 = vector.load %arg8[%c0_17, %c0_18] : memref<128x4xf32, #tpu.memory_space<vmem>>, vector<128x4xf32>
    tpu.vector_store %arg8[%c0_17, %c0_18], %20 {strides = array<i32>} : memref<128x4xf32, #tpu.memory_space<vmem>>, vector<128x4xf32>,
    return
  }
  func.func @transform_0(%arg0: i32) -> (i32, i32) {
    %c0_i32 = arith.constant 0 : i32
    %c0_i32_0 = arith.constant 0 : i32
    return %arg0, %c0_i32 : i32, i32
  }
  func.func @transform_1(%arg0: i32) -> (i32, i32) {
    %c0_i32 = arith.constant 0 : i32
    %c0_i32_0 = arith.constant 0 : i32
    %c0_i32_1 = arith.constant 0 : i32
    return %c0_i32, %c0_i32_0 : i32, i32
  }
  func.func @transform_2(%arg0: i32) -> (i32, i32) {
    %c0_i32 = arith.constant 0 : i32
    %c0_i32_0 = arith.constant 0 : i32
    %c0_i32_1 = arith.constant 0 : i32
    return %c0_i32, %c0_i32_0 : i32, i32
  }
  func.func @transform_3(%arg0: i32) -> (i32, i32) {
    %c0_i32 = arith.constant 0 : i32
    %c0_i32_0 = arith.constant 0 : i32
    %c0_i32_1 = arith.constant 0 : i32
    return %c0_i32, %c0_i32_0 : i32, i32
  }
  func.func @transform_4(%arg0: i32) -> (i32, i32) {
    %c0_i32 = arith.constant 0 : i32
    %c0_i32_0 = arith.constant 0 : i32
    %c0_i32_1 = arith.constant 0 : i32
    return %c0_i32, %c0_i32_0 : i32, i32
  }
  func.func @transform_5(%arg0: i32) -> (i32, i32) {
    %c0_i32 = arith.constant 0 : i32
    %c0_i32_0 = arith.constant 0 : i32
    %c0_i32_1 = arith.constant 0 : i32
    return %c0_i32, %c0_i32_0 : i32, i32
  }
  func.func @transform_6(%arg0: i32) -> (i32, i32) {
    %c0_i32 = arith.constant 0 : i32
    %c0_i32_0 = arith.constant 0 : i32
    %c0_i32_1 = arith.constant 0 : i32
    return %c0_i32, %c0_i32_0 : i32, i32
  }
  func.func @transform_7(%arg0: i32) -> (i32, i32) {
    %c0_i32 = arith.constant 0 : i32
    %c0_i32_0 = arith.constant 0 : i32
    return %arg0, %c0_i32 : i32, i32
  }
}

</mosaic_0001>

<bundles_post_ra>
// kernel: tpu_custom_call.1
= control target key start
LH: loop header
LB: loop body
LE: loop exit
PB: predicated region body
PF: predicated region fallthrough
CT: control target
= control target key end

     0   :  { %s1300_s24 = smov 0   ;;  %s1807_s0 = inlined_call_operand.vmem [shape: f32[384,16], index: 0, kind: input, shape index: {}]   ;;  %s1808_s1 = inlined_call_operand.vmem [shape: f32[16,256], index: 1, kind: input, shape index: {}]   ;;  %s1809_s2 = inlined_call_operand.vmem [shape: f32[1,256], index: 2, kind: input, shape index: {}]   ;;  %s1810_s3 = inlined_call_operand.vmem [shape: f32[256,256], index: 3, kind: input, shape index: {}]   ;;  %s1811_s4 = inlined_call_operand.vmem [shape: f32[1,256], index: 4, kind: input, shape index: {}]   ;;  %s1812_s5 = inlined_call_operand.vmem [shape: f32[256,4], index: 5, kind: input, shape index: {}]   ;;  %s1813_s6 = inlined_call_operand.vmem [shape: f32[1,4], index: 6, kind: input, shape index: {}]   ;;  %s1814_s7 = inlined_call_operand.vmem [shape: f32[384,4], index: 7, kind: output, shape index: {}]  }
   0x1 LB: > { %s1136_s25 = sadd.s32 4294967295, %s1258_s24   ;;  %p1140_p0 = scmp.ge.s32.totalorder %s1258_s24, 1  ;;  %s1258_s24 = sphi %s1300_s24, %s17_s24  }
   0x2   : > { %p238_p1 = scmp.lt.s32.totalorder %s1258_s24, 4 }
   0x4   : > { %p239_p2 = pnand %p1140_p0, %p238_p1 }
   0x5   : > { %s1141_s9 = sshll.u32 (!%p239_p2), %s1136_s25, 4 }
   0x6   : > { %242 = sbr.rel (%p239_p2) target bundleno = 547 (0x223), region = 48  ;;  %p271_p3 = scmp.lt.s32.totalorder (!%p239_p2), %s1141_s9, 47 }
   0xb   : > { %v300_v0 = vld [vmem:[%s1808_s1 + $0x10] sm:$0xff]  ;;  %v298_v1 = vld [vmem:[%s1808_s1] sm:$0xff]  ;;  %v301_v2 = vld [vmem:[%s1808_s1 + $0x18] sm:$0xff]  ;;  %s1816_s9 = smov (!%p271_p3, %s1141_s9), 47  ;;  %vm308_vm0 = vcmask 130048   ;;  %vm1063_vm1 = vcmask 31744  }
   0xc   : > { %371 = vmatpush.msra.mxu0 %v300_v0  ;;  %436 = vmatpush.msra.mxu1 %v301_v2  ;;  %v299_v3 = vld [vmem:[%s1808_s1 + $0x8] sm:$0xff]  ;;  %v550_v4 = vld [vmem:[%s1810_s3 + $0xf8] sm:$0xff]  ;;  %s1142_s20 = sshll.u32 %s1816_s9, 3  ;;  %v549_v36 = vld [vmem:[%s1810_s3 + $0xf0] sm:$0xff] }
   0xd   : > { %v582_v5 = vld [vmem:[%s1810_s3 + $0x1f8] sm:$0xff]  ;;  %v548_v6 = vld [vmem:[%s1810_s3 + $0xe8] sm:$0xff]  ;;  %s1340_s23 = scalar_lea.vmem %s1807_s0, %s1142_s20  ;;  %589 = vmatpush.msra.mxu2 %v549_v36  ;;  %v547_v38 = vld [vmem:[%s1810_s3 + $0xe0] sm:$0xff]  ;;  %s1755_s21 = scalar_lea.vmem %s1814_s7, %s1142_s20 }
   0xe   : > { %372 = vmatpush.msra.mxu0 %v298_v1  ;;  %437 = vmatpush.msra.mxu1 %v299_v3  ;;  %v580_v7 = vld [vmem:[%s1810_s3 + $0x1e8] sm:$0xff]  ;;  %v546_v8 = vld [vmem:[%s1810_s3 + $0xd8] sm:$0xff]  ;;  %v282_v10 = vld [vmem:[%s1340_s23] sm:$0xff] }
   0xf   : > { %v578_v9 = vld [vmem:[%s1810_s3 + $0x1d8] sm:$0xff]  ;;  %1145 = vmatmul.msk.f32.vlgmr.msra.gmra.mxu0 %vm308_vm0, %v282_v10  ;;  %1161 = vmatmul.msk.f32.vlgmr.msra.gmra.mxu1 %vm308_vm0, %v282_v10  ;;  %v544_v11 = vld [vmem:[%s1810_s3 + $0xc8] sm:$0xff]  ;;  %v284_v16 = vld [vmem:[%s1340_s23 + $0x10] sm:$0xff] }
  0x10   : > { %719 = vmatpush.msrb.mxu0 %v550_v4  ;;  %784 = vmatpush.msrb.mxu1 %v582_v5  ;;  %v576_v12 = vld [vmem:[%s1810_s3 + $0x1c8] sm:$0xff]  ;;  %v542_v14 = vld [vmem:[%s1810_s3 + $0xb8] sm:$0xff]  ;;  %v286_v22 = vld [vmem:[%s1340_s23 + $0x20] sm:$0xff] }
  0x11   : > { %v283_v13 = vld [vmem:[%s1340_s23 + $0x8] sm:$0xff]  ;;  %v574_v15 = vld [vmem:[%s1810_s3 + $0x1b8] sm:$0xff]  ;;  %v288_v28 = vld [vmem:[%s1340_s23 + $0x30] sm:$0xff]  ;;  %590 = vmatpush.msra.mxu2 %v547_v38 }
  0x12   : > { %720 = vmatpush.msrb.mxu0 %v548_v6  ;;  %785 = vmatpush.msrb.mxu1 %v580_v7  ;;  %v540_v17 = vld [vmem:[%s1810_s3 + $0xa8] sm:$0xff]  ;;  %v285_v19 = vld [vmem:[%s1340_s23 + $0x18] sm:$0xff]  ;;  %v290_v34 = vld [vmem:[%s1340_s23 + $0x40] sm:$0xff] }
  0x13   : > { %v572_v18 = vld [vmem:[%s1810_s3 + $0x1a8] sm:$0xff]  ;;  %v538_v20 = vld [vmem:[%s1810_s3 + $0x98] sm:$0xff]  ;;  %v581_v39 = vld [vmem:[%s1810_s3 + $0x1f0] sm:$0xff] }
  0x14   : > { %721 = vmatpush.msrb.mxu0 %v546_v8  ;;  %786 = vmatpush.msrb.mxu1 %v578_v9  ;;  %v570_v21 = vld [vmem:[%s1810_s3 + $0x198] sm:$0xff]  ;;  %v536_v23 = vld [vmem:[%s1810_s3 + $0x88] sm:$0xff]  ;;  %v545_v40 = vld [vmem:[%s1810_s3 + $0xd0] sm:$0xff] }
  0x15   : > { %v568_v24 = vld [vmem:[%s1810_s3 + $0x188] sm:$0xff]  ;;  %v534_v26 = vld [vmem:[%s1810_s3 + $0x78] sm:$0xff]  ;;  %654 = vmatpush.msra.mxu3 %v581_v39  ;;  %v579_v41 = vld [vmem:[%s1810_s3 + $0x1e0] sm:$0xff]  ;;  %591 = vmatpush.msra.mxu2 %v545_v40 }
  0x16   : > { %722 = vmatpush.msrb.mxu0 %v544_v11  ;;  %787 = vmatpush.msrb.mxu1 %v576_v12  ;;  %v287_v25 = vld [vmem:[%s1340_s23 + $0x28] sm:$0xff]  ;;  %v566_v27 = vld [vmem:[%s1810_s3 + $0x178] sm:$0xff]  ;;  %v543_v43 = vld [vmem:[%s1810_s3 + $0xc0] sm:$0xff] }
  0x17   : > { %1146 = vmatmul.msk.f32.gmra.mxu0 %vm308_vm0, %v283_v13  ;;  %1162 = vmatmul.msk.f32.gmra.mxu1 %vm308_vm0, %v283_v13  ;;  %v532_v29 = vld [vmem:[%s1810_s3 + $0x68] sm:$0xff]  ;;  %v289_v31 = vld [vmem:[%s1340_s23 + $0x38] sm:$0xff]  ;;  %v577_v44 = vld [vmem:[%s1810_s3 + $0x1d0] sm:$0xff] }
  0x18   : > { %723 = vmatpush.msrb.mxu0 %v542_v14  ;;  %788 = vmatpush.msrb.mxu1 %v574_v15  ;;  %v564_v30 = vld [vmem:[%s1810_s3 + $0x168] sm:$0xff]  ;;  %v530_v32 = vld [vmem:[%s1810_s3 + $0x58] sm:$0xff]  ;;  %v541_v46 = vld [vmem:[%s1810_s3 + $0xb0] sm:$0xff] }
  0x19   : > { %v562_v33 = vld [vmem:[%s1810_s3 + $0x158] sm:$0xff]  ;;  %v528_v35 = vld [vmem:[%s1810_s3 + $0x48] sm:$0xff]  ;;  %655 = vmatpush.msra.mxu3 %v579_v41  ;;  %592 = vmatpush.msra.mxu2 %v543_v43  ;;  %v575_v47 = vld [vmem:[%s1810_s3 + $0x1c0] sm:$0xff] }
  0x1a   : > { %724 = vmatpush.msrb.mxu0 %v540_v17  ;;  %789 = vmatpush.msrb.mxu1 %v572_v18  ;;  %v560_v37 = vld [vmem:[%s1810_s3 + $0x148] sm:$0xff]  ;;  %v526_v45 = vld [vmem:[%s1810_s3 + $0x38] sm:$0xff]  ;;  %v539_v49 = vld [vmem:[%s1810_s3 + $0xa0] sm:$0xff] }
  0x1b   : > { %v291_v42 = vld [vmem:[%s1340_s23 + $0x48] sm:$0xff]  ;;  %656 = vmatpush.msra.mxu3 %v577_v44  ;;  %v558_v48 = vld [vmem:[%s1810_s3 + $0x138] sm:$0xff]  ;;  %v573_v50 = vld [vmem:[%s1810_s3 + $0x1b0] sm:$0xff]  ;;  %593 = vmatpush.msra.mxu2 %v541_v46 }
  0x1c   : > { %725 = vmatpush.msrb.mxu0 %v538_v20  ;;  %790 = vmatpush.msrb.mxu1 %v570_v21  ;;  %v537_v51 = vld [vmem:[%s1810_s3 + $0x90] sm:$0xff]  ;;  %v571_v52 = vld [vmem:[%s1810_s3 + $0x1a0] sm:$0xff]  ;;  %v524_v56 = vld [vmem:[%s1810_s3 + $0x28] sm:$0xff] }
  0x1d   : > { %657 = vmatpush.msra.mxu3 %v575_v47  ;;  %v292_v53 = vld [vmem:[%s1340_s23 + $0x50] sm:$0xff]  ;;  %594 = vmatpush.msra.mxu2 %v539_v49  ;;  %v535_v54 = vld [vmem:[%s1810_s3 + $0x80] sm:$0xff]  ;;  %v556_v59 = vld [vmem:[%s1810_s3 + $0x128] sm:$0xff] }
  0x1e   : > { %726 = vmatpush.msrb.mxu0 %v536_v23  ;;  %791 = vmatpush.msrb.mxu1 %v568_v24  ;;  %v569_v55 = vld [vmem:[%s1810_s3 + $0x190] sm:$0xff]  ;;  %v567_v58 = vld [vmem:[%s1810_s3 + $0x180] sm:$0xff]  ;;  %v293_v0 = vld [vmem:[%s1340_s23 + $0x58] sm:$0xff] }
  0x1f   : > { %1147 = vmatmul.msk.f32.gmra.mxu0 %vm308_vm0, %v284_v16  ;;  %1163 = vmatmul.msk.f32.gmra.mxu1 %vm308_vm0, %v284_v16  ;;  %v533_v57 = vld [vmem:[%s1810_s3 + $0x70] sm:$0xff]  ;;  %v531_v60 = vld [vmem:[%s1810_s3 + $0x60] sm:$0xff]  ;;  %v522_v3 = vld [vmem:[%s1810_s3 + $0x18] sm:$0xff] }
  0x20   : > { %727 = vmatpush.msrb.mxu0 %v534_v26  ;;  %792 = vmatpush.msrb.mxu1 %v566_v27  ;;  %v565_v61 = vld [vmem:[%s1810_s3 + $0x170] sm:$0xff]  ;;  %v563_v63 = vld [vmem:[%s1810_s3 + $0x160] sm:$0xff]  ;;  %v554_v6 = vld [vmem:[%s1810_s3 + $0x118] sm:$0xff] }
  0x21   : > { %658 = vmatpush.msra.mxu3 %v573_v50  ;;  %595 = vmatpush.msra.mxu2 %v537_v51  ;;  %v529_v62 = vld [vmem:[%s1810_s3 + $0x50] sm:$0xff]  ;;  %v527_v1 = vld [vmem:[%s1810_s3 + $0x40] sm:$0xff]  ;;  %v520_v14 = vld [vmem:[%s1810_s3 + $0x8] sm:$0xff] }
  0x22   : > { %728 = vmatpush.msrb.mxu0 %v532_v29  ;;  %793 = vmatpush.msrb.mxu1 %v564_v30  ;;  %v561_v2 = vld [vmem:[%s1810_s3 + $0x150] sm:$0xff]  ;;  %v559_v5 = vld [vmem:[%s1810_s3 + $0x140] sm:$0xff]  ;;  %v552_v16 = vld [vmem:[%s1810_s3 + $0x108] sm:$0xff] }
  0x23   : > { %659 = vmatpush.msra.mxu3 %v571_v52  ;;  %596 = vmatpush.msra.mxu2 %v535_v54  ;;  %v525_v4 = vld [vmem:[%s1810_s3 + $0x30] sm:$0xff]  ;;  %v523_v7 = vld [vmem:[%s1810_s3 + $0x20] sm:$0xff]  ;;  %v295_v17 = vld [vmem:[%s1340_s23 + $0x68] sm:$0xff] }
  0x24   : > { %729 = vmatpush.msrb.mxu0 %v530_v32  ;;  %794 = vmatpush.msrb.mxu1 %v562_v33  ;;  %v557_v8 = vld [vmem:[%s1810_s3 + $0x130] sm:$0xff]  ;;  %v294_v9 = vld [vmem:[%s1340_s23 + $0x60] sm:$0xff]  ;;  %v297_v20 = vld [vmem:[%s1340_s23 + $0x78] sm:$0xff] }
  0x25   : > { %660 = vmatpush.msra.mxu3 %v569_v55  ;;  %597 = vmatpush.msra.mxu2 %v533_v57  ;;  %v521_v10 = vld [vmem:[%s1810_s3 + $0x10] sm:$0xff]  ;;  %v555_v11 = vld [vmem:[%s1810_s3 + $0x120] sm:$0xff]  ;;  %v912_v21 = vld [vmem:[%s1812_s5 + $0xf8] sm:$0xff] }
  0x26   : > { %730 = vmatpush.msrb.mxu0 %v528_v35  ;;  %795 = vmatpush.msrb.mxu1 %v560_v37  ;;  %v519_v12 = vld [vmem:[%s1810_s3] sm:$0xff]  ;;  %v553_v13 = vld [vmem:[%s1810_s3 + $0x110] sm:$0xff]  ;;  %v894_v33 = vld [vmem:[%s1812_s5 + $0x68] sm:$0xff] }
  0x27   : > { %1148 = vmatmul.msk.f32.gmra.mxu0 %vm308_vm0, %v285_v19  ;;  %1164 = vmatmul.msk.f32.gmra.mxu1 %vm308_vm0, %v285_v19  ;;  %v551_v15 = vld [vmem:[%s1810_s3 + $0x100] sm:$0xff]  ;;  %v296_v18 = vld [vmem:[%s1340_s23 + $0x70] sm:$0xff]  ;;  %v896_v19 = vld [vmem:[%s1812_s5 + $0x78] sm:$0xff] }
  0x28   : > { %731 = vmatpush.msrb.mxu0 %v526_v45  ;;  %796 = vmatpush.msrb.mxu1 %v558_v48  ;;  %v911_v30 = vld [vmem:[%s1812_s5 + $0xf0] sm:$0xff]  ;;  %v910_v38 = vld [vmem:[%s1812_s5 + $0xe8] sm:$0xff]  ;;  %v893_v41 = vld [vmem:[%s1812_s5 + $0x60] sm:$0xff] }
  0x29   : > { %661 = vmatpush.msra.mxu3 %v567_v58  ;;  %598 = vmatpush.msra.mxu2 %v531_v60  ;;  %v909_v46 = vld [vmem:[%s1812_s5 + $0xe0] sm:$0xff]  ;;  %v892_v49 = vld [vmem:[%s1812_s5 + $0x58] sm:$0xff]  ;;  %v891_v57 = vld [vmem:[%s1812_s5 + $0x50] sm:$0xff] }
  0x2a   : > { %732 = vmatpush.msrb.mxu0 %v524_v56  ;;  %797 = vmatpush.msrb.mxu1 %v556_v59  ;;  %v908_v54 = vld [vmem:[%s1812_s5 + $0xd8] sm:$0xff] }
  0x2b   : > { %662 = vmatpush.msra.mxu3 %v565_v61  ;;  %599 = vmatpush.msra.mxu2 %v529_v62  ;;  %v907_v62 = vld [vmem:[%s1812_s5 + $0xd0] sm:$0xff] }
  0x2c   : > { %733 = vmatpush.msrb.mxu0 %v522_v3  ;;  %798 = vmatpush.msrb.mxu1 %v554_v6 }
  0x2d   : > { %663 = vmatpush.msra.mxu3 %v563_v63  ;;  %600 = vmatpush.msra.mxu2 %v527_v1  ;;  %v890_v1 = vld [vmem:[%s1812_s5 + $0x48] sm:$0xff] }
  0x2e   : > { %734 = vmatpush.msrb.mxu0 %v520_v14  ;;  %799 = vmatpush.msrb.mxu1 %v552_v16  ;;  %v905_v16 = vld [vmem:[%s1812_s5 + $0xc0] sm:$0xff] }
  0x2f   : > { %1149 = vmatmul.msk.f32.gmra.mxu0 %vm308_vm0, %v286_v22  ;;  %1165 = vmatmul.msk.f32.gmra.mxu1 %vm308_vm0, %v286_v22  ;;  %v302_v22 = vld [vmem:[%s1809_s2] sm:$0x3] }
  0x30   : > { %664 = vmatpush.msra.mxu3 %v561_v2  ;;  %601 = vmatpush.msra.mxu2 %v525_v4  ;;  %v1579_v23 = vperm.slane %v302_v22, 0  ;;  %v1581_v24 = vperm.slane %v302_v22, 1 }
  0x31   : > { %917 = vmatpush.msra.mxu0 %v896_v19  ;;  %982 = vmatpush.msra.mxu1 %v912_v21 }
  0x32   : > { %665 = vmatpush.msra.mxu3 %v559_v5  ;;  %602 = vmatpush.msra.mxu2 %v523_v7 }
  0x33   : > { %983 = vmatpush.msra.mxu1 %v911_v30 }
  0x34   : > { %666 = vmatpush.msra.mxu3 %v557_v8  ;;  %603 = vmatpush.msra.mxu2 %v521_v10  ;;  %v906_v8 = vld [vmem:[%s1812_s5 + $0xc8] sm:$0xff] }
  0x35   : > { %984 = vmatpush.msra.mxu1 %v910_v38 }
  0x36   : > { %667 = vmatpush.msra.mxu3 %v555_v11  ;;  %604 = vmatpush.msra.mxu2 %v519_v12 }
  0x37   : > { %1150 = vmatmul.msk.f32.gmra.mxu0 %vm308_vm0, %v287_v25  ;;  %1166 = vmatmul.msk.f32.gmra.mxu1 %vm308_vm0, %v287_v25  ;;  %v895_v25 = vld [vmem:[%s1812_s5 + $0x70] sm:$0xff] }
  0x38   : > { %668 = vmatpush.msra.mxu3 %v553_v13  ;;  %1179 = vmatpush.msrb.mxu2 %v896_v19 }
  0x39   : > { %918 = vmatpush.msra.mxu0 %v895_v25  ;;  %985 = vmatpush.msra.mxu1 %v909_v46 }
  0x3a   : > { %669 = vmatpush.msra.mxu3 %v551_v15  ;;  %1180 = vmatpush.msrb.mxu2 %v895_v25 }
  0x3b   : > { %919 = vmatpush.msra.mxu0 %v894_v33  ;;  %986 = vmatpush.msra.mxu1 %v908_v54 }
  0x3c   : > { %1195 = vmatpush.msrb.mxu3 %v912_v21  ;;  %1181 = vmatpush.msrb.mxu2 %v894_v33 }
  0x3d   : > { %920 = vmatpush.msra.mxu0 %v893_v41  ;;  %987 = vmatpush.msra.mxu1 %v907_v62 }
  0x3e   : > { %1196 = vmatpush.msrb.mxu3 %v911_v30  ;;  %1182 = vmatpush.msrb.mxu2 %v893_v41 }
  0x3f   : > { %1151 = vmatmul.msk.f32.gmra.mxu0 %vm308_vm0, %v288_v28  ;;  %1167 = vmatmul.msk.f32.gmra.mxu1 %vm308_vm0, %v288_v28 }
  0x40   : > { %1197 = vmatpush.msrb.mxu3 %v910_v38  ;;  %1183 = vmatpush.msrb.mxu2 %v892_v49 }
  0x41   : > { %921 = vmatpush.msra.mxu0 %v892_v49  ;;  %988 = vmatpush.msra.mxu1 %v906_v8 }
  0x42   : > { %1198 = vmatpush.msrb.mxu3 %v909_v46  ;;  %1184 = vmatpush.msrb.mxu2 %v891_v57 }
  0x43   : > { %922 = vmatpush.msra.mxu0 %v891_v57  ;;  %989 = vmatpush.msra.mxu1 %v905_v16 }
  0x44   : > { %1199 = vmatpush.msrb.mxu3 %v908_v54  ;;  %1185 = vmatpush.msrb.mxu2 %v890_v1 }
  0x45   : > { %923 = vmatpush.msra.mxu0 %v890_v1 }
  0x46   : > { %1200 = vmatpush.msrb.mxu3 %v907_v62 }
  0x47   : > { %1152 = vmatmul.msk.f32.gmra.mxu0 %vm308_vm0, %v289_v31  ;;  %1168 = vmatmul.msk.f32.gmra.mxu1 %vm308_vm0, %v289_v31 }
  0x48   : > { %1201 = vmatpush.msrb.mxu3 %v906_v8 }
  0x4a   : > { %1202 = vmatpush.msrb.mxu3 %v905_v16 }
  0x4f   : > { %1153 = vmatmul.msk.f32.gmra.mxu0 %vm308_vm0, %v290_v34  ;;  %1169 = vmatmul.msk.f32.gmra.mxu1 %vm308_vm0, %v290_v34 }
  0x57   : > { %1154 = vmatmul.msk.f32.gmra.mxu0 %vm308_vm0, %v291_v42  ;;  %1170 = vmatmul.msk.f32.gmra.mxu1 %vm308_vm0, %v291_v42 }
  0x5f   : > { %1155 = vmatmul.msk.f32.gmra.mxu0 %vm308_vm0, %v292_v53  ;;  %1171 = vmatmul.msk.f32.gmra.mxu1 %vm308_vm0, %v292_v53 }
  0x67   : > { %1156 = vmatmul.msk.f32.gmra.mxu0 %vm308_vm0, %v293_v0  ;;  %1172 = vmatmul.msk.f32.gmra.mxu1 %vm308_vm0, %v293_v0 }
  0x6f   : > { %1157 = vmatmul.msk.f32.gmra.mxu0 %vm308_vm0, %v294_v9  ;;  %1173 = vmatmul.msk.f32.gmra.mxu1 %vm308_vm0, %v294_v9  ;;  %v889_v9 = vld [vmem:[%s1812_s5 + $0x40] sm:$0xff] }
  0x70   : > { %1186 = vmatpush.msrb.mxu2 %v889_v9  ;;  %924 = vmatpush.msra.mxu0 %v889_v9 }
  0x77   : > { %1158 = vmatmul.msk.f32.gmra.mxu0 %vm308_vm0, %v295_v17  ;;  %1174 = vmatmul.msk.f32.gmra.mxu1 %vm308_vm0, %v295_v17  ;;  %v888_v17 = vld [vmem:[%s1812_s5 + $0x38] sm:$0xff] }
  0x78   : > { %1187 = vmatpush.msrb.mxu2 %v888_v17  ;;  %925 = vmatpush.msra.mxu0 %v888_v17 }
  0x7f   : > { %1159 = vmatmul.msk.f32.gmra.mxu0 %vm308_vm0, %v296_v18  ;;  %1175 = vmatmul.msk.f32.gmra.mxu1 %vm308_vm0, %v296_v18 }
  0x87   : > { %1160 = vmatmul.msk.f32.gmra.mxu0 %vm308_vm0, %v297_v20  ;;  %1176 = vmatmul.msk.f32.gmra.mxu1 %vm308_vm0, %v297_v20 }
  0x8c   : > { %v374_v26 = vpop.f32.mrf.mxu0  ;;  %v439_v27 = vpop.f32.mrf.mxu1 }
  0x8d   : > { %v375_v28 = vadd.f32 %v374_v26, %v1579_v23  ;;  %v440_v29 = vadd.f32 %v439_v27, %v1581_v24  ;;  %v904_v26 = vld [vmem:[%s1812_s5 + $0xb8] sm:$0xff]  ;;  %v887_v27 = vld [vmem:[%s1812_s5 + $0x30] sm:$0xff] }
  0x8e   : > { %1203 = vmatpush.msrb.mxu3 %v904_v26  ;;  %990 = vmatpush.msra.mxu1 %v904_v26 }
  0x8f   : > { %v487_v31 = vmax.f32 %v375_v28, 0.0  ;;  %v488_v32 = vmax.f32 %v440_v29, 0.0  ;;  %1188 = vmatpush.msrb.mxu2 %v887_v27  ;;  %926 = vmatpush.msra.mxu0 %v887_v27  ;;  %v583_v27 = vld [vmem:[%s1811_s4] sm:$0x3] }
  0x91   : > { %605 = vmatmul.f32.vlgmr.msra.gmra.mxu2 %v487_v31  ;;  %735 = vmatmul.f32.vlgmr.msrb.gmra.mxu0 %v487_v31 }
  0x92   : > { %670 = vmatmul.f32.vlgmr.msra.gmra.mxu3 %v488_v32  ;;  %800 = vmatmul.f32.vlgmr.msrb.gmra.mxu1 %v488_v32 }
  0x94   : > { %v377_v34 = vpop.f32.mrf.mxu0  ;;  %v442_v35 = vpop.f32.mrf.mxu1 }
  0x95   : > { %v378_v36 = vadd.f32 %v377_v34, %v1579_v23  ;;  %v443_v37 = vadd.f32 %v442_v35, %v1581_v24  ;;  %v903_v34 = vld [vmem:[%s1812_s5 + $0xb0] sm:$0xff]  ;;  %v886_v35 = vld [vmem:[%s1812_s5 + $0x28] sm:$0xff] }
  0x96   : > { %1204 = vmatpush.msrb.mxu3 %v903_v34  ;;  %991 = vmatpush.msra.mxu1 %v903_v34 }
  0x97   : > { %v489_v39 = vmax.f32 %v378_v36, 0.0  ;;  %v490_v40 = vmax.f32 %v443_v37, 0.0  ;;  %1189 = vmatpush.msrb.mxu2 %v886_v35  ;;  %927 = vmatpush.msra.mxu0 %v886_v35 }
  0x99   : > { %608 = vmatmul.f32.gmra.mxu2 %v489_v39  ;;  %738 = vmatmul.f32.gmra.mxu0 %v489_v39 }
  0x9a   : > { %673 = vmatmul.f32.gmra.mxu3 %v490_v40  ;;  %803 = vmatmul.f32.gmra.mxu1 %v490_v40 }
  0x9c   : > { %v380_v42 = vpop.f32.mrf.mxu0  ;;  %v445_v43 = vpop.f32.mrf.mxu1 }
  0x9d   : > { %v381_v44 = vadd.f32 %v380_v42, %v1579_v23  ;;  %v446_v45 = vadd.f32 %v445_v43, %v1581_v24  ;;  %v902_v42 = vld [vmem:[%s1812_s5 + $0xa8] sm:$0xff]  ;;  %v885_v43 = vld [vmem:[%s1812_s5 + $0x20] sm:$0xff] }
  0x9e   : > { %1205 = vmatpush.msrb.mxu3 %v902_v42  ;;  %992 = vmatpush.msra.mxu1 %v902_v42 }
  0x9f   : > { %v491_v47 = vmax.f32 %v381_v44, 0.0  ;;  %v492_v48 = vmax.f32 %v446_v45, 0.0  ;;  %1190 = vmatpush.msrb.mxu2 %v885_v43  ;;  %928 = vmatpush.msra.mxu0 %v885_v43 }
  0xa1   : > { %611 = vmatmul.f32.gmra.mxu2 %v491_v47  ;;  %741 = vmatmul.f32.gmra.mxu0 %v491_v47 }
  0xa2   : > { %676 = vmatmul.f32.gmra.mxu3 %v492_v48  ;;  %806 = vmatmul.f32.gmra.mxu1 %v492_v48 }
  0xa4   : > { %v383_v50 = vpop.f32.mrf.mxu0  ;;  %v448_v51 = vpop.f32.mrf.mxu1 }
  0xa5   : > { %v384_v52 = vadd.f32 %v383_v50, %v1579_v23  ;;  %v449_v53 = vadd.f32 %v448_v51, %v1581_v24  ;;  %v901_v50 = vld [vmem:[%s1812_s5 + $0xa0] sm:$0xff]  ;;  %v884_v51 = vld [vmem:[%s1812_s5 + $0x18] sm:$0xff] }
  0xa6   : > { %1206 = vmatpush.msrb.mxu3 %v901_v50  ;;  %993 = vmatpush.msra.mxu1 %v901_v50 }
  0xa7   : > { %v493_v55 = vmax.f32 %v384_v52, 0.0  ;;  %v494_v56 = vmax.f32 %v449_v53, 0.0  ;;  %1191 = vmatpush.msrb.mxu2 %v884_v51  ;;  %929 = vmatpush.msra.mxu0 %v884_v51 }
  0xa9   : > { %614 = vmatmul.f32.gmra.mxu2 %v493_v55  ;;  %744 = vmatmul.f32.gmra.mxu0 %v493_v55 }
  0xaa   : > { %679 = vmatmul.f32.gmra.mxu3 %v494_v56  ;;  %809 = vmatmul.f32.gmra.mxu1 %v494_v56 }
  0xac   : > { %v386_v58 = vpop.f32.mrf.mxu0  ;;  %v451_v59 = vpop.f32.mrf.mxu1 }
  0xad   : > { %v387_v60 = vadd.f32 %v386_v58, %v1579_v23  ;;  %v452_v61 = vadd.f32 %v451_v59, %v1581_v24  ;;  %v900_v58 = vld [vmem:[%s1812_s5 + $0x98] sm:$0xff]  ;;  %v883_v59 = vld [vmem:[%s1812_s5 + $0x10] sm:$0xff] }
  0xae   : > { %1207 = vmatpush.msrb.mxu3 %v900_v58  ;;  %994 = vmatpush.msra.mxu1 %v900_v58 }
  0xaf   : > { %v495_v63 = vmax.f32 %v387_v60, 0.0  ;;  %v496_v0 = vmax.f32 %v452_v61, 0.0  ;;  %v899_v60 = vld [vmem:[%s1812_s5 + $0x90] sm:$0xff]  ;;  %1192 = vmatpush.msrb.mxu2 %v883_v59  ;;  %930 = vmatpush.msra.mxu0 %v883_v59 }
  0xb0   : > { %1208 = vmatpush.msrb.mxu3 %v899_v60  ;;  %995 = vmatpush.msra.mxu1 %v899_v60 }
  0xb1   : > { %617 = vmatmul.f32.gmra.mxu2 %v495_v63  ;;  %747 = vmatmul.f32.gmra.mxu0 %v495_v63 }
  0xb2   : > { %682 = vmatmul.f32.gmra.mxu3 %v496_v0  ;;  %812 = vmatmul.f32.gmra.mxu1 %v496_v0 }
  0xb4   : > { %v389_v2 = vpop.f32.mrf.mxu0  ;;  %v454_v3 = vpop.f32.mrf.mxu1 }
  0xb5   : > { %v390_v4 = vadd.f32 %v389_v2, %v1579_v23  ;;  %v455_v5 = vadd.f32 %v454_v3, %v1581_v24  ;;  %v898_v3 = vld [vmem:[%s1812_s5 + $0x88] sm:$0xff] }
  0xb6   : > { %996 = vmatpush.msra.mxu1 %v898_v3  ;;  %1209 = vmatpush.msrb.mxu3 %v898_v3 }
  0xb7   : > { %v497_v6 = vmax.f32 %v390_v4, 0.0  ;;  %v498_v7 = vmax.f32 %v455_v5, 0.0  ;;  %v882_v4 = vld [vmem:[%s1812_s5 + $0x8] sm:$0xff]  ;;  %v897_v5 = vld [vmem:[%s1812_s5 + $0x80] sm:$0xff] }
  0xb8   : > { %1193 = vmatpush.msrb.mxu2 %v882_v4  ;;  %931 = vmatpush.msra.mxu0 %v882_v4 }
  0xb9   : > { %620 = vmatmul.f32.gmra.mxu2 %v497_v6  ;;  %750 = vmatmul.f32.gmra.mxu0 %v497_v6 }
  0xba   : > { %685 = vmatmul.f32.gmra.mxu3 %v498_v7  ;;  %815 = vmatmul.f32.gmra.mxu1 %v498_v7 }
  0xbb   : > { %997 = vmatpush.msra.mxu1 %v897_v5  ;;  %1210 = vmatpush.msrb.mxu3 %v897_v5 }
  0xbc   : > { %v392_v10 = vpop.f32.mrf.mxu0  ;;  %v457_v11 = vpop.f32.mrf.mxu1 }
  0xbd   : > { %v393_v12 = vadd.f32 %v392_v10, %v1579_v23  ;;  %v458_v13 = vadd.f32 %v457_v11, %v1581_v24 }
  0xbf   : > { %v499_v14 = vmax.f32 %v393_v12, 0.0  ;;  %v500_v15 = vmax.f32 %v458_v13, 0.0  ;;  %v881_v12 = vld [vmem:[%s1812_s5] sm:$0xff] }
  0xc0   : > { %932 = vmatpush.msra.mxu0 %v881_v12  ;;  %1194 = vmatpush.msrb.mxu2 %v881_v12 }
  0xc1   : > { %623 = vmatmul.f32.gmra.mxu2 %v499_v14  ;;  %753 = vmatmul.f32.gmra.mxu0 %v499_v14 }
  0xc2   : > { %688 = vmatmul.f32.gmra.mxu3 %v500_v15  ;;  %818 = vmatmul.f32.gmra.mxu1 %v500_v15 }
  0xc4   : > { %v395_v18 = vpop.f32.mrf.mxu0  ;;  %v460_v19 = vpop.f32.mrf.mxu1 }
  0xc5   : > { %v396_v20 = vadd.f32 %v395_v18, %v1579_v23  ;;  %v461_v21 = vadd.f32 %v460_v19, %v1581_v24 }
  0xc7   : > { %v501_v22 = vmax.f32 %v396_v20, 0.0  ;;  %v502_v25 = vmax.f32 %v461_v21, 0.0 }
  0xc9   : > { %626 = vmatmul.f32.gmra.mxu2 %v501_v22  ;;  %756 = vmatmul.f32.gmra.mxu0 %v501_v22 }
  0xca   : > { %691 = vmatmul.f32.gmra.mxu3 %v502_v25  ;;  %821 = vmatmul.f32.gmra.mxu1 %v502_v25 }
  0xcc   : > { %v398_v28 = vpop.f32.mrf.mxu0  ;;  %v463_v29 = vpop.f32.mrf.mxu1 }
  0xcd   : > { %v399_v30 = vadd.f32 %v398_v28, %v1579_v23  ;;  %v464_v31 = vadd.f32 %v463_v29, %v1581_v24  ;;  %v1708_v28 = vperm.slane %v583_v27, 1 }
  0xcf   : > { %v503_v32 = vmax.f32 %v399_v30, 0.0  ;;  %v504_v33 = vmax.f32 %v464_v31, 0.0 }
  0xd1   : > { %629 = vmatmul.f32.gmra.mxu2 %v503_v32  ;;  %759 = vmatmul.f32.gmra.mxu0 %v503_v32 }
  0xd2   : > { %694 = vmatmul.f32.gmra.mxu3 %v504_v33  ;;  %824 = vmatmul.f32.gmra.mxu1 %v504_v33 }
  0xd4   : > { %v401_v36 = vpop.f32.mrf.mxu0  ;;  %v466_v37 = vpop.f32.mrf.mxu1 }
  0xd5   : > { %v402_v38 = vadd.f32 %v401_v36, %v1579_v23  ;;  %v467_v39 = vadd.f32 %v466_v37, %v1581_v24 }
  0xd7   : > { %v505_v40 = vmax.f32 %v402_v38, 0.0  ;;  %v506_v41 = vmax.f32 %v467_v39, 0.0 }
  0xd9   : > { %632 = vmatmul.f32.gmra.mxu2 %v505_v40  ;;  %762 = vmatmul.f32.gmra.mxu0 %v505_v40 }
  0xda   : > { %697 = vmatmul.f32.gmra.mxu3 %v506_v41  ;;  %827 = vmatmul.f32.gmra.mxu1 %v506_v41 }
  0xdc   : > { %v404_v44 = vpop.f32.mrf.mxu0  ;;  %v469_v45 = vpop.f32.mrf.mxu1 }
  0xdd   : > { %v405_v46 = vadd.f32 %v404_v44, %v1579_v23  ;;  %v470_v47 = vadd.f32 %v469_v45, %v1581_v24 }
  0xdf   : > { %v507_v48 = vmax.f32 %v405_v46, 0.0  ;;  %v508_v49 = vmax.f32 %v470_v47, 0.0 }
  0xe1   : > { %635 = vmatmul.f32.gmra.mxu2 %v507_v48  ;;  %765 = vmatmul.f32.gmra.mxu0 %v507_v48 }
  0xe2   : > { %700 = vmatmul.f32.gmra.mxu3 %v508_v49  ;;  %830 = vmatmul.f32.gmra.mxu1 %v508_v49 }
  0xe4   : > { %v407_v52 = vpop.f32.mrf.mxu0  ;;  %v472_v53 = vpop.f32.mrf.mxu1 }
  0xe5   : > { %v408_v54 = vadd.f32 %v407_v52, %v1579_v23  ;;  %v473_v55 = vadd.f32 %v472_v53, %v1581_v24 }
  0xe7   : > { %v509_v56 = vmax.f32 %v408_v54, 0.0  ;;  %v510_v57 = vmax.f32 %v473_v55, 0.0 }
  0xe9   : > { %638 = vmatmul.f32.gmra.mxu2 %v509_v56  ;;  %768 = vmatmul.f32.gmra.mxu0 %v509_v56 }
  0xea   : > { %703 = vmatmul.f32.gmra.mxu3 %v510_v57  ;;  %833 = vmatmul.f32.gmra.mxu1 %v510_v57 }
  0xec   : > { %v410_v61 = vpop.f32.mrf.mxu0  ;;  %v475_v62 = vpop.f32.mrf.mxu1 }
  0xed   : > { %v411_v63 = vadd.f32 %v410_v61, %v1579_v23  ;;  %v476_v0 = vadd.f32 %v475_v62, %v1581_v24 }
  0xef   : > { %v511_v1 = vmax.f32 %v411_v63, 0.0  ;;  %v512_v2 = vmax.f32 %v476_v0, 0.0 }
  0xf1   : > { %641 = vmatmul.f32.gmra.mxu2 %v511_v1  ;;  %771 = vmatmul.f32.gmra.mxu0 %v511_v1 }
  0xf2   : > { %706 = vmatmul.f32.gmra.mxu3 %v512_v2  ;;  %836 = vmatmul.f32.gmra.mxu1 %v512_v2 }
  0xf4   : > { %v413_v6 = vpop.f32.mrf.mxu0  ;;  %v478_v7 = vpop.f32.mrf.mxu1 }
  0xf5   : > { %v414_v8 = vadd.f32 %v413_v6, %v1579_v23  ;;  %v479_v9 = vadd.f32 %v478_v7, %v1581_v24 }
  0xf7   : > { %v513_v10 = vmax.f32 %v414_v8, 0.0  ;;  %v514_v11 = vmax.f32 %v479_v9, 0.0 }
  0xf9   : > { %644 = vmatmul.f32.gmra.mxu2 %v513_v10  ;;  %774 = vmatmul.f32.gmra.mxu0 %v513_v10 }
  0xfa   : > { %709 = vmatmul.f32.gmra.mxu3 %v514_v11  ;;  %839 = vmatmul.f32.gmra.mxu1 %v514_v11 }
  0xfc   : > { %v416_v13 = vpop.f32.mrf.mxu0  ;;  %v481_v14 = vpop.f32.mrf.mxu1 }
  0xfd   : > { %v417_v15 = vadd.f32 %v416_v13, %v1579_v23  ;;  %v482_v16 = vadd.f32 %v481_v14, %v1581_v24 }
  0xff   : > { %v515_v17 = vmax.f32 %v417_v15, 0.0  ;;  %v516_v18 = vmax.f32 %v482_v16, 0.0 }
 0x101   : > { %647 = vmatmul.f32.gmra.mxu2 %v515_v17  ;;  %777 = vmatmul.f32.gmra.mxu0 %v515_v17 }
 0x102   : > { %712 = vmatmul.f32.gmra.mxu3 %v516_v18  ;;  %842 = vmatmul.f32.gmra.mxu1 %v516_v18 }
 0x104   : > { %v419_v19 = vpop.f32.mrf.mxu0  ;;  %v484_v20 = vpop.f32.mrf.mxu1 }
 0x105   : > { %v420_v21 = vadd.f32 %v419_v19, %v1579_v23  ;;  %v485_v22 = vadd.f32 %v484_v20, %v1581_v24  ;;  %v1711_v23 = vperm.slane %v583_v27, 0 }
 0x107   : > { %v517_v25 = vmax.f32 %v420_v21, 0.0  ;;  %v518_v26 = vmax.f32 %v485_v22, 0.0 }
 0x109   : > { %650 = vmatmul.f32.gmra.mxu2 %v517_v25  ;;  %780 = vmatmul.f32.gmra.mxu0 %v517_v25 }
 0x10a   : > { %715 = vmatmul.f32.gmra.mxu3 %v518_v26  ;;  %845 = vmatmul.f32.gmra.mxu1 %v518_v26 }
 0x10e   : > { %v736_v29 = vpop.f32.mrf.mxu0 }
 0x10f   : > { %v737_v30 = vadd.f32 %v736_v29, %v1708_v28  ;;  %v801_v31 = vpop.f32.mrf.mxu1 }
 0x111   : > { %v802_v32 = vadd.f32 %v801_v31, %v737_v30 }
 0x113   : > { %v850_v24 = vmax.f32 %v802_v32, 0.0 }
 0x114   : > { %v606_v33 = vpop.f32.mrf.mxu2 }
 0x115   : > { %v607_v34 = vadd.f32 %v606_v33, %v1711_v23  ;;  %998 = vmatmul.f32.vlgmr.msra.gmra.mxu1 %v850_v24  ;;  %v671_v35 = vpop.f32.mrf.mxu3 }
 0x116   : > { %v739_v36 = vpop.f32.mrf.mxu0 }
 0x117   : > { %v672_v37 = vadd.f32 %v671_v35, %v607_v34  ;;  %v740_v38 = vadd.f32 %v739_v36, %v1708_v28  ;;  %v804_v39 = vpop.f32.mrf.mxu1 }
 0x119   : > { %v849_v40 = vmax.f32 %v672_v37, 0.0  ;;  %v805_v41 = vadd.f32 %v804_v39, %v740_v38 }
 0x11b   : > { %v852_v42 = vmax.f32 %v805_v41, 0.0  ;;  %933 = vmatmul.f32.vlgmr.msra.gmra.mxu0 %v849_v40 }
 0x11c   : > { %v609_v43 = vpop.f32.mrf.mxu2 }
 0x11d   : > { %v610_v44 = vadd.f32 %v609_v43, %v1711_v23  ;;  %1001 = vmatmul.f32.vlgmr.msrb.gmra.mxu3 %v852_v42  ;;  %v674_v45 = vpop.f32.mrf.mxu3 }
 0x11e   : > { %v742_v46 = vpop.f32.mrf.mxu0 }
 0x11f   : > { %v675_v47 = vadd.f32 %v674_v45, %v610_v44  ;;  %v743_v48 = vadd.f32 %v742_v46, %v1708_v28  ;;  %v807_v49 = vpop.f32.mrf.mxu1 }
 0x121   : > { %v851_v50 = vmax.f32 %v675_v47, 0.0  ;;  %v808_v51 = vadd.f32 %v807_v49, %v743_v48 }
 0x123   : > { %v854_v52 = vmax.f32 %v808_v51, 0.0  ;;  %936 = vmatmul.f32.vlgmr.msrb.gmra.mxu2 %v851_v50 }
 0x124   : > { %v612_v53 = vpop.f32.mrf.mxu2 }
 0x125   : > { %v613_v54 = vadd.f32 %v612_v53, %v1711_v23  ;;  %1004 = vmatmul.f32.gmra.mxu3 %v854_v52  ;;  %v677_v55 = vpop.f32.mrf.mxu3 }
 0x126   : > { %v745_v56 = vpop.f32.mrf.mxu0 }
 0x127   : > { %v678_v57 = vadd.f32 %v677_v55, %v613_v54  ;;  %v746_v58 = vadd.f32 %v745_v56, %v1708_v28  ;;  %v810_v59 = vpop.f32.mrf.mxu1 }
 0x129   : > { %v811_v60 = vadd.f32 %v810_v59, %v746_v58  ;;  %v853_v61 = vmax.f32 %v678_v57, 0.0 }
 0x12b   : > { %v856_v62 = vmax.f32 %v811_v60, 0.0  ;;  %939 = vmatmul.f32.gmra.mxu2 %v853_v61 }
 0x12c   : > { %v615_v63 = vpop.f32.mrf.mxu2 }
 0x12d   : > { %v616_v0 = vadd.f32 %v615_v63, %v1711_v23  ;;  %1007 = vmatmul.f32.gmra.mxu3 %v856_v62  ;;  %v680_v1 = vpop.f32.mrf.mxu3 }
 0x12e   : > { %v748_v2 = vpop.f32.mrf.mxu0 }
 0x12f   : > { %v681_v3 = vadd.f32 %v680_v1, %v616_v0  ;;  %v749_v4 = vadd.f32 %v748_v2, %v1708_v28  ;;  %v813_v5 = vpop.f32.mrf.mxu1 }
 0x131   : > { %v814_v6 = vadd.f32 %v813_v5, %v749_v4  ;;  %v855_v7 = vmax.f32 %v681_v3, 0.0 }
 0x133   : > { %v858_v8 = vmax.f32 %v814_v6, 0.0  ;;  %942 = vmatmul.f32.gmra.mxu2 %v855_v7 }
 0x134   : > { %v618_v9 = vpop.f32.mrf.mxu2 }
 0x135   : > { %v619_v10 = vadd.f32 %v618_v9, %v1711_v23  ;;  %1010 = vmatmul.f32.gmra.mxu3 %v858_v8  ;;  %v683_v11 = vpop.f32.mrf.mxu3 }
 0x136   : > { %v751_v12 = vpop.f32.mrf.mxu0 }
 0x137   : > { %v684_v13 = vadd.f32 %v683_v11, %v619_v10  ;;  %v752_v14 = vadd.f32 %v751_v12, %v1708_v28  ;;  %v816_v15 = vpop.f32.mrf.mxu1 }
 0x139   : > { %v817_v16 = vadd.f32 %v816_v15, %v752_v14  ;;  %v857_v17 = vmax.f32 %v684_v13, 0.0 }
 0x13b   : > { %v860_v18 = vmax.f32 %v817_v16, 0.0  ;;  %945 = vmatmul.f32.gmra.mxu2 %v857_v17 }
 0x13c   : > { %v621_v19 = vpop.f32.mrf.mxu2 }
 0x13d   : > { %v622_v20 = vadd.f32 %v621_v19, %v1711_v23  ;;  %1013 = vmatmul.f32.gmra.mxu3 %v860_v18  ;;  %v686_v21 = vpop.f32.mrf.mxu3 }
 0x13e   : > { %v754_v22 = vpop.f32.mrf.mxu0 }
 0x13f   : > { %v687_v25 = vadd.f32 %v686_v21, %v622_v20  ;;  %v755_v26 = vadd.f32 %v754_v22, %v1708_v28  ;;  %v819_v27 = vpop.f32.mrf.mxu1 }
 0x141   : > { %v820_v29 = vadd.f32 %v819_v27, %v755_v26  ;;  %v859_v30 = vmax.f32 %v687_v25, 0.0 }
 0x143   : > { %v862_v31 = vmax.f32 %v820_v29, 0.0  ;;  %948 = vmatmul.f32.gmra.mxu2 %v859_v30 }
 0x144   : > { %v624_v32 = vpop.f32.mrf.mxu2 }
 0x145   : > { %v625_v24 = vadd.f32 %v624_v32, %v1711_v23  ;;  %1016 = vmatmul.f32.gmra.mxu3 %v862_v31  ;;  %v689_v33 = vpop.f32.mrf.mxu3 }
 0x146   : > { %v757_v34 = vpop.f32.mrf.mxu0 }
 0x147   : > { %v690_v35 = vadd.f32 %v689_v33, %v625_v24  ;;  %v758_v36 = vadd.f32 %v757_v34, %v1708_v28  ;;  %v822_v37 = vpop.f32.mrf.mxu1 }
 0x149   : > { %v823_v38 = vadd.f32 %v822_v37, %v758_v36  ;;  %v861_v39 = vmax.f32 %v690_v35, 0.0 }
 0x14b   : > { %v864_v40 = vmax.f32 %v823_v38, 0.0  ;;  %951 = vmatmul.f32.gmra.mxu2 %v861_v39 }
 0x14c   : > { %v627_v41 = vpop.f32.mrf.mxu2 }
 0x14d   : > { %v628_v42 = vadd.f32 %v627_v41, %v1711_v23  ;;  %1019 = vmatmul.f32.gmra.mxu3 %v864_v40  ;;  %v692_v43 = vpop.f32.mrf.mxu3 }
 0x14e   : > { %v760_v44 = vpop.f32.mrf.mxu0 }
 0x14f   : > { %v693_v45 = vadd.f32 %v692_v43, %v628_v42  ;;  %v761_v46 = vadd.f32 %v760_v44, %v1708_v28  ;;  %v825_v47 = vpop.f32.mrf.mxu1 }
 0x151   : > { %v863_v48 = vmax.f32 %v693_v45, 0.0  ;;  %v826_v49 = vadd.f32 %v825_v47, %v761_v46 }
 0x153   : > { %v866_v50 = vmax.f32 %v826_v49, 0.0  ;;  %954 = vmatmul.f32.gmra.mxu2 %v863_v48 }
 0x154   : > { %v630_v51 = vpop.f32.mrf.mxu2 }
 0x155   : > { %v631_v52 = vadd.f32 %v630_v51, %v1711_v23  ;;  %1022 = vmatmul.f32.gmra.mxu3 %v866_v50  ;;  %v695_v53 = vpop.f32.mrf.mxu3 }
 0x156   : > { %v763_v54 = vpop.f32.mrf.mxu0 }
 0x157   : > { %v696_v55 = vadd.f32 %v695_v53, %v631_v52  ;;  %v764_v56 = vadd.f32 %v763_v54, %v1708_v28  ;;  %v828_v57 = vpop.f32.mrf.mxu1 }
 0x159   : > { %v865_v58 = vmax.f32 %v696_v55, 0.0  ;;  %v829_v59 = vadd.f32 %v828_v57, %v764_v56 }
 0x15b   : > { %v868_v60 = vmax.f32 %v829_v59, 0.0  ;;  %957 = vmatmul.f32.gmra.mxu2 %v865_v58 }
 0x15c   : > { %v633_v61 = vpop.f32.mrf.mxu2 }
 0x15d   : > { %v634_v62 = vadd.f32 %v633_v61, %v1711_v23  ;;  %1025 = vmatmul.f32.gmra.mxu3 %v868_v60  ;;  %v698_v63 = vpop.f32.mrf.mxu3 }
 0x15e   : > { %v766_v0 = vpop.f32.mrf.mxu0 }
 0x15f   : > { %v699_v1 = vadd.f32 %v698_v63, %v634_v62  ;;  %v767_v2 = vadd.f32 %v766_v0, %v1708_v28  ;;  %v831_v3 = vpop.f32.mrf.mxu1  ;;  %v1747_v0 = vld [vmem:[%s1813_s6] ss:$0 sm:$0xff] }
 0x161   : > { %v867_v4 = vmax.f32 %v699_v1, 0.0  ;;  %v832_v5 = vadd.f32 %v831_v3, %v767_v2 }
 0x163   : > { %v870_v6 = vmax.f32 %v832_v5, 0.0  ;;  %960 = vmatmul.f32.gmra.mxu2 %v867_v4 }
 0x164   : > { %v636_v7 = vpop.f32.mrf.mxu2 }
 0x165   : > { %v637_v8 = vadd.f32 %v636_v7, %v1711_v23  ;;  %1028 = vmatmul.f32.gmra.mxu3 %v870_v6  ;;  %v701_v9 = vpop.f32.mrf.mxu3 }
 0x166   : > { %v769_v10 = vpop.f32.mrf.mxu0 }
 0x167   : > { %v702_v11 = vadd.f32 %v701_v9, %v637_v8  ;;  %v770_v12 = vadd.f32 %v769_v10, %v1708_v28  ;;  %v834_v13 = vpop.f32.mrf.mxu1 }
 0x169   : > { %v869_v14 = vmax.f32 %v702_v11, 0.0  ;;  %v835_v15 = vadd.f32 %v834_v13, %v770_v12 }
 0x16b   : > { %v872_v16 = vmax.f32 %v835_v15, 0.0  ;;  %963 = vmatmul.f32.gmra.mxu2 %v869_v14 }
 0x16c   : > { %v639_v17 = vpop.f32.mrf.mxu2 }
 0x16d   : > { %v640_v18 = vadd.f32 %v639_v17, %v1711_v23  ;;  %1031 = vmatmul.f32.gmra.mxu3 %v872_v16  ;;  %v704_v19 = vpop.f32.mrf.mxu3 }
 0x16e   : > { %v772_v20 = vpop.f32.mrf.mxu0 }
 0x16f   : > { %v705_v21 = vadd.f32 %v704_v19, %v640_v18  ;;  %v773_v22 = vadd.f32 %v772_v20, %v1708_v28  ;;  %v837_v25 = vpop.f32.mrf.mxu1 }
 0x171   : > { %v871_v26 = vmax.f32 %v705_v21, 0.0  ;;  %v838_v27 = vadd.f32 %v837_v25, %v773_v22 }
 0x173   : > { %v874_v29 = vmax.f32 %v838_v27, 0.0  ;;  %966 = vmatmul.f32.gmra.mxu2 %v871_v26 }
 0x174   : > { %v642_v30 = vpop.f32.mrf.mxu2 }
 0x175   : > { %v643_v31 = vadd.f32 %v642_v30, %v1711_v23  ;;  %1034 = vmatmul.f32.gmra.mxu3 %v874_v29  ;;  %v707_v32 = vpop.f32.mrf.mxu3 }
 0x176   : > { %v775_v24 = vpop.f32.mrf.mxu0 }
 0x177   : > { %v708_v33 = vadd.f32 %v707_v32, %v643_v31  ;;  %v776_v34 = vadd.f32 %v775_v24, %v1708_v28  ;;  %v840_v35 = vpop.f32.mrf.mxu1 }
 0x179   : > { %v873_v36 = vmax.f32 %v708_v33, 0.0  ;;  %v841_v37 = vadd.f32 %v840_v35, %v776_v34 }
 0x17b   : > { %v876_v38 = vmax.f32 %v841_v37, 0.0  ;;  %969 = vmatmul.f32.gmra.mxu2 %v873_v36 }
 0x17c   : > { %v645_v39 = vpop.f32.mrf.mxu2 }
 0x17d   : > { %v646_v40 = vadd.f32 %v645_v39, %v1711_v23  ;;  %1037 = vmatmul.f32.gmra.mxu3 %v876_v38  ;;  %v710_v41 = vpop.f32.mrf.mxu3 }
 0x17e   : > { %v778_v42 = vpop.f32.mrf.mxu0 }
 0x17f   : > { %v711_v43 = vadd.f32 %v710_v41, %v646_v40  ;;  %v779_v44 = vadd.f32 %v778_v42, %v1708_v28  ;;  %v843_v45 = vpop.f32.mrf.mxu1 }
 0x181   : > { %v875_v46 = vmax.f32 %v711_v43, 0.0  ;;  %v844_v47 = vadd.f32 %v843_v45, %v779_v44 }
 0x183   : > { %v878_v48 = vmax.f32 %v844_v47, 0.0  ;;  %972 = vmatmul.f32.gmra.mxu2 %v875_v46 }
 0x184   : > { %v648_v49 = vpop.f32.mrf.mxu2 }
 0x185   : > { %v649_v50 = vadd.f32 %v648_v49, %v1711_v23  ;;  %1040 = vmatmul.f32.gmra.mxu3 %v878_v48  ;;  %v713_v51 = vpop.f32.mrf.mxu3 }
 0x186   : > { %v781_v52 = vpop.f32.mrf.mxu0 }
 0x187   : > { %v714_v53 = vadd.f32 %v713_v51, %v649_v50  ;;  %v782_v54 = vadd.f32 %v781_v52, %v1708_v28  ;;  %v846_v55 = vpop.f32.mrf.mxu1 }
 0x189   : > { %v877_v56 = vmax.f32 %v714_v53, 0.0  ;;  %v847_v57 = vadd.f32 %v846_v55, %v782_v54 }
 0x18b   : > { %v880_v58 = vmax.f32 %v847_v57, 0.0  ;;  %975 = vmatmul.f32.gmra.mxu2 %v877_v56 }
 0x18c   : > { %v651_v59 = vpop.f32.mrf.mxu2 }
 0x18d   : > { %v652_v60 = vadd.f32 %v651_v59, %v1711_v23  ;;  %1043 = vmatmul.f32.gmra.mxu3 %v880_v58  ;;  %v716_v61 = vpop.f32.mrf.mxu3 }
 0x18f   : > { %v717_v62 = vadd.f32 %v716_v61, %v652_v60 }
 0x191   : > { %v879_v63 = vmax.f32 %v717_v62, 0.0 }
 0x192   : > { %v999_v2 = vpop.f32.mrf.mxu1 }
 0x193   : > { %978 = vmatmul.f32.gmra.mxu2 %v879_v63 }
 0x198   : > { %v934_v28 = vpop.f32.mrf.mxu0 }
 0x199   : > { %v935_v1 = vadd.f32 %v1747_v0, %v934_v28 }
 0x19b   : > { %v1000_v3 = vadd.f32 %v999_v2, %v935_v1 }
 0x19d   : > { %1220 = vtanh.f32 %v1000_v3 }
 0x1a0   : > { %v1002_v4 = vpop.f32.mrf.mxu3 }
 0x1a3   : > { %v1221_v23 = vpop.eup %1220 }
 0x1a4   : > { %1064 = vst.msk [vmem:[%s1755_s21] sm:$0xff] %vm1063_vm1, %v1221_v23 }
 0x1a6   : > { %v937_v5 = vpop.f32.mrf.mxu2 }
 0x1a7   : > { %v938_v6 = vadd.f32 %v1747_v0, %v937_v5 }
 0x1a8   : > { %v1005_v7 = vpop.f32.mrf.mxu3 }
 0x1a9   : > { %v1003_v8 = vadd.f32 %v1002_v4, %v938_v6 }
 0x1ab   : > { %1222 = vtanh.f32 %v1003_v8 }
 0x1ae   : > { %v940_v9 = vpop.f32.mrf.mxu2 }
 0x1af   : > { %v941_v10 = vadd.f32 %v1747_v0, %v940_v9 }
 0x1b0   : > { %v1008_v11 = vpop.f32.mrf.mxu3 }
 0x1b1   : > { %v1223_v12 = vpop.eup %1222  ;;  %v1006_v13 = vadd.f32 %v1005_v7, %v941_v10 }
 0x1b2   : > { %1065 = vst.msk [vmem:[%s1755_s21 + $0x8] sm:$0xff] %vm1063_vm1, %v1223_v12 }
 0x1b3   : > { %1224 = vtanh.f32 %v1006_v13 }
 0x1b6   : > { %v943_v14 = vpop.f32.mrf.mxu2 }
 0x1b7   : > { %v944_v15 = vadd.f32 %v1747_v0, %v943_v14 }
 0x1b8   : > { %v1011_v16 = vpop.f32.mrf.mxu3 }
 0x1b9   : > { %v1225_v17 = vpop.eup %1224  ;;  %v1009_v18 = vadd.f32 %v1008_v11, %v944_v15 }
 0x1ba   : > { %1066 = vst.msk [vmem:[%s1755_s21 + $0x10] sm:$0xff] %vm1063_vm1, %v1225_v17 }
 0x1bb   : > { %1226 = vtanh.f32 %v1009_v18 }
 0x1be   : > { %v946_v19 = vpop.f32.mrf.mxu2 }
 0x1bf   : > { %v947_v20 = vadd.f32 %v1747_v0, %v946_v19 }
 0x1c0   : > { %v1014_v21 = vpop.f32.mrf.mxu3 }
 0x1c1   : > { %v1227_v22 = vpop.eup %1226  ;;  %v1012_v25 = vadd.f32 %v1011_v16, %v947_v20 }
 0x1c2   : > { %1067 = vst.msk [vmem:[%s1755_s21 + $0x18] sm:$0xff] %vm1063_vm1, %v1227_v22 }
 0x1c3   : > { %1228 = vtanh.f32 %v1012_v25 }
 0x1c6   : > { %v949_v26 = vpop.f32.mrf.mxu2 }
 0x1c7   : > { %v950_v27 = vadd.f32 %v1747_v0, %v949_v26 }
 0x1c8   : > { %v1017_v29 = vpop.f32.mrf.mxu3 }
 0x1c9   : > { %v1229_v30 = vpop.eup %1228  ;;  %v1015_v31 = vadd.f32 %v1014_v21, %v950_v27 }
 0x1ca   : > { %1068 = vst.msk [vmem:[%s1755_s21 + $0x20] sm:$0xff] %vm1063_vm1, %v1229_v30 }
 0x1cb   : > { %1230 = vtanh.f32 %v1015_v31 }
 0x1ce   : > { %v952_v32 = vpop.f32.mrf.mxu2 }
 0x1cf   : > { %v953_v24 = vadd.f32 %v1747_v0, %v952_v32 }
 0x1d0   : > { %v1020_v33 = vpop.f32.mrf.mxu3 }
 0x1d1   : > { %v1231_v34 = vpop.eup %1230  ;;  %v1018_v35 = vadd.f32 %v1017_v29, %v953_v24 }
 0x1d2   : > { %1069 = vst.msk [vmem:[%s1755_s21 + $0x28] sm:$0xff] %vm1063_vm1, %v1231_v34 }
 0x1d3   : > { %1232 = vtanh.f32 %v1018_v35 }
 0x1d6   : > { %v955_v36 = vpop.f32.mrf.mxu2 }
 0x1d7   : > { %v956_v37 = vadd.f32 %v1747_v0, %v955_v36 }
 0x1d8   : > { %v1023_v38 = vpop.f32.mrf.mxu3 }
 0x1d9   : > { %v1233_v39 = vpop.eup %1232  ;;  %v1021_v40 = vadd.f32 %v1020_v33, %v956_v37 }
 0x1da   : > { %1070 = vst.msk [vmem:[%s1755_s21 + $0x30] sm:$0xff] %vm1063_vm1, %v1233_v39 }
 0x1db   : > { %1234 = vtanh.f32 %v1021_v40 }
 0x1de   : > { %v958_v41 = vpop.f32.mrf.mxu2 }
 0x1df   : > { %v959_v42 = vadd.f32 %v1747_v0, %v958_v41 }
 0x1e0   : > { %v1026_v43 = vpop.f32.mrf.mxu3 }
 0x1e1   : > { %v1235_v44 = vpop.eup %1234  ;;  %v1024_v45 = vadd.f32 %v1023_v38, %v959_v42 }
 0x1e2   : > { %1071 = vst.msk [vmem:[%s1755_s21 + $0x38] sm:$0xff] %vm1063_vm1, %v1235_v44 }
 0x1e3   : > { %1236 = vtanh.f32 %v1024_v45 }
 0x1e6   : > { %v961_v46 = vpop.f32.mrf.mxu2 }
 0x1e7   : > { %v962_v47 = vadd.f32 %v1747_v0, %v961_v46 }
 0x1e8   : > { %v1029_v48 = vpop.f32.mrf.mxu3 }
 0x1e9   : > { %v1237_v49 = vpop.eup %1236  ;;  %v1027_v50 = vadd.f32 %v1026_v43, %v962_v47 }
 0x1ea   : > { %1072 = vst.msk [vmem:[%s1755_s21 + $0x40] sm:$0xff] %vm1063_vm1, %v1237_v49 }
 0x1eb   : > { %1238 = vtanh.f32 %v1027_v50 }
 0x1ee   : > { %v964_v51 = vpop.f32.mrf.mxu2 }
 0x1ef   : > { %v965_v52 = vadd.f32 %v1747_v0, %v964_v51 }
 0x1f0   : > { %v1032_v53 = vpop.f32.mrf.mxu3 }
 0x1f1   : > { %v1239_v54 = vpop.eup %1238  ;;  %v1030_v55 = vadd.f32 %v1029_v48, %v965_v52 }
 0x1f2   : > { %1073 = vst.msk [vmem:[%s1755_s21 + $0x48] sm:$0xff] %vm1063_vm1, %v1239_v54 }
 0x1f3   : > { %1240 = vtanh.f32 %v1030_v55 }
 0x1f6   : > { %v967_v56 = vpop.f32.mrf.mxu2 }
 0x1f7   : > { %v968_v57 = vadd.f32 %v1747_v0, %v967_v56 }
 0x1f8   : > { %v1035_v60 = vpop.f32.mrf.mxu3 }
 0x1f9   : > { %v1241_v58 = vpop.eup %1240  ;;  %v1033_v59 = vadd.f32 %v1032_v53, %v968_v57 }
 0x1fa   : > { %1074 = vst.msk [vmem:[%s1755_s21 + $0x50] sm:$0xff] %vm1063_vm1, %v1241_v58 }
 0x1fb   : > { %1242 = vtanh.f32 %v1033_v59 }
 0x1fe   : > { %v970_v61 = vpop.f32.mrf.mxu2 }
 0x1ff   : > { %v971_v62 = vadd.f32 %v1747_v0, %v970_v61 }
 0x200   : > { %v1038_v1 = vpop.f32.mrf.mxu3 }
 0x201   : > { %v1243_v63 = vpop.eup %1242  ;;  %v1036_v28 = vadd.f32 %v1035_v60, %v971_v62 }
 0x202   : > { %1075 = vst.msk [vmem:[%s1755_s21 + $0x58] sm:$0xff] %vm1063_vm1, %v1243_v63 }
 0x203   : > { %1244 = vtanh.f32 %v1036_v28 }
 0x206   : > { %v973_v2 = vpop.f32.mrf.mxu2 }
 0x207   : > { %v974_v3 = vadd.f32 %v1747_v0, %v973_v2 }
 0x208   : > { %v1041_v5 = vpop.f32.mrf.mxu3 }
 0x209   : > { %v1245_v4 = vpop.eup %1244  ;;  %v1039_v23 = vadd.f32 %v1038_v1, %v974_v3 }
 0x20a   : > { %1076 = vst.msk [vmem:[%s1755_s21 + $0x60] sm:$0xff] %vm1063_vm1, %v1245_v4 }
 0x20b   : > { %1246 = vtanh.f32 %v1039_v23 }
 0x20e   : > { %v976_v6 = vpop.f32.mrf.mxu2 }
 0x20f   : > { %v977_v7 = vadd.f32 %v1747_v0, %v976_v6 }
 0x210   : > { %v1044_v12 = vpop.f32.mrf.mxu3 }
 0x211   : > { %v1247_v8 = vpop.eup %1246  ;;  %v1042_v9 = vadd.f32 %v1041_v5, %v977_v7 }
 0x212   : > { %1077 = vst.msk [vmem:[%s1755_s21 + $0x68] sm:$0xff] %vm1063_vm1, %v1247_v8 }
 0x213   : > { %1248 = vtanh.f32 %v1042_v9 }
 0x216   : > { %v979_v10 = vpop.f32.mrf.mxu2 }
 0x217   : > { %v980_v11 = vadd.f32 %v1747_v0, %v979_v10 }
 0x219   : > { %v1249_v13 = vpop.eup %1248  ;;  %v1045_v14 = vadd.f32 %v1044_v12, %v980_v11 }
 0x21a   : > { %1078 = vst.msk [vmem:[%s1755_s21 + $0x70] sm:$0xff] %vm1063_vm1, %v1249_v13 }
 0x21b   : > { %1250 = vtanh.f32 %v1045_v14 }
 0x221   : > { %v1251_v15 = vpop.eup %1250 }
 0x222   : > { %1079 = vst.msk [vmem:[%s1755_s21 + $0x78] sm:$0xff] %vm1063_vm1, %v1251_v15 }
 0x223 PF: > { %s17_s24 = sadd.s32 1, %s1258_s24  }
 0x224   : > { %p14_p4 = scmp.ge.s32.totalorder %s17_s24, 5  }
 0x226   :  { %16 = sbr.rel (!%p14_p4) target bundleno = 1 (0x1), region = 78 }

</bundles_post_ra>
